<compile_context>
chip_gen: v5e
topology: v5e:2x2
jax: 0.10.0
libtpu: 0.0.40
codegen_flags: <defaults>
</compile_context>

<pallas_src>
import jax
import jax.numpy as jnp
from jax.experimental import pallas as pl
from jax.experimental.pallas import tpu as pltpu


def _round_up(x: int, m: int) -> int:
    return ((x + m - 1) // m) * m


def _mlp_kernel(x_ref, w1_ref, b1_ref, w2_ref, b2_ref, o_ref):
    # Layer 1 on the MXU: [block_m, D] @ [D, Hp] -> [block_m, Hp] (f32 acc).
    h = jnp.dot(x_ref[...], w1_ref[...], preferred_element_type=jnp.float32)
    # Bias + ReLU on the VPU (b1_ref is [1, Hp], broadcasts over sublanes).
    h = jnp.maximum(h + b1_ref[...], 0.0)
    # Layer 2 as VPU multiply + XLU lane reduction (w2_ref is a [1, Hp] row);
    # avoids an MXU pass whose N dimension would be 1.  b2 is a scalar in SMEM.
    out = jnp.sum(h * w2_ref[...], axis=-1, keepdims=True) + b2_ref[0, 0]
    # Lane-dense store: broadcast the [block_m, 1] result across 128 lanes so
    # the store path uses full-width unmasked vst; wrapper slices column 0.
    o_ref[...] = jnp.broadcast_to(out, o_ref.shape)


def mlp_forward(x, w1, b1, w2, b2, *, block_m=512):
    """Fused MLP forward.

    x  : [B, D] float32
    w1 : [D, H] float32   (PyTorch Linear_to_hidden.weight.T)
    b1 : [H]    float32
    w2 : [H, 1] float32   (PyTorch Linear_to_out.weight.T)
    b2 : [1]    float32
    returns [B, 1] float32
    """
    B, D = x.shape
    H = w1.shape[1]

    # Pad hidden dim to a lane-dense multiple of 128 (zeros -> relu(0)=0 and
    # zero w2 entries, so padded units contribute nothing).
    Hp = _round_up(max(H, 128), 128)
    # Batch tiling: block_m a multiple of 8, batch padded to a multiple of it.
    block_m = _round_up(min(block_m, _round_up(B, 8)), 8)
    B_pad = _round_up(B, block_m)

    x_p = jnp.pad(x, ((0, B_pad - B), (0, 0))) if B_pad != B else x
    w1_p = jnp.pad(w1, ((0, 0), (0, Hp - H)))
    b1_p = jnp.pad(b1, (0, Hp - H)).reshape(1, Hp)
    w2_row = jnp.pad(w2.reshape(-1), (0, Hp - H)).reshape(1, Hp)
    b2_s = b2.reshape(1, 1)

    grid = (B_pad // block_m,)
    out_slab = pl.pallas_call(
        _mlp_kernel,
        out_shape=jax.ShapeDtypeStruct((B_pad, 128), jnp.float32),
        grid=grid,
        in_specs=[
            # X: tiled along batch, pipelined / double-buffered automatically.
            pl.BlockSpec((block_m, D), lambda i: (i, 0)),
            # Weights & b1: same block every step -> stay VMEM-resident.
            pl.BlockSpec((D, Hp), lambda i: (0, 0)),
            pl.BlockSpec((1, Hp), lambda i: (0, 0)),
            pl.BlockSpec((1, Hp), lambda i: (0, 0)),
            # b2: scalar in SMEM, no padded VMEM tile / extra DMA stream.
            pl.BlockSpec(memory_space=pltpu.MemorySpace.SMEM),
        ],
        out_specs=pl.BlockSpec((block_m, 128), lambda i: (i, 0)),
        compiler_params=pltpu.CompilerParams(
            dimension_semantics=("parallel",)),
    )(x_p, w1_p, b1_p, w2_row, b2_s)

    # Undo the lane-dense slab + batch padding.
    return out_slab[:B, :1]


def _ref_mlp(x, w1, b1, w2, b2):
    return jnp.maximum(x @ w1 + b1, 0.0) @ w2 + b2


if __name__ == "__main__":
    # Small shapes consistent with the module: batch=8, input_dim=16, hidden_dim=32.
    B, D, H = 8, 16, 32
    key = jax.random.PRNGKey(0)
    kx, kw1, kb1, kw2, kb2 = jax.random.split(key, 5)

    x = jax.random.normal(kx, (B, D), dtype=jnp.float32)
    # Deterministic parameter init (mimics nn.Linear's uniform fan-in init).
    bound1 = 1.0 / (D ** 0.5)
    w1 = jax.random.uniform(kw1, (D, H), jnp.float32, -bound1, bound1)
    b1 = jax.random.uniform(kb1, (H,), jnp.float32, -bound1, bound1)
    bound2 = 1.0 / (H ** 0.5)
    w2 = jax.random.uniform(kw2, (H, 1), jnp.float32, -bound2, bound2)
    b2 = jax.random.uniform(kb2, (1,), jnp.float32, -bound2, bound2)

    out = jax.block_until_ready(mlp_forward(x, w1, b1, w2, b2))
    ref = _ref_mlp(x, w1, b1, w2, b2)
    assert out.shape == (B, 1)
    assert jnp.allclose(out, ref, atol=1e-5, rtol=1e-5)

    # Second check: non-multiple batch + multi-step grid (exercises padding,
    # the pipelined batch tiling, and the lane-dense output slab).
    B2 = 300
    x2 = jax.random.normal(jax.random.PRNGKey(1), (B2, D), dtype=jnp.float32)
    out2 = jax.block_until_ready(mlp_forward(x2, w1, b1, w2, b2, block_m=128))
    ref2 = _ref_mlp(x2, w1, b1, w2, b2)
    assert out2.shape == (B2, 1)
    assert jnp.allclose(out2, ref2, atol=1e-5, rtol=1e-5)

    print("KERNEL_OK")
</pallas_src>

<mosaic_0001>
module attributes {stable_mosaic.version = 11 : i64} {
  func.func @_mlp_kernel(%arg0: i32, %arg1: memref<8x16xf32, #tpu.memory_space<vmem>>, %arg2: memref<16x128xf32, #tpu.memory_space<vmem>>, %arg3: memref<1x128xf32, #tpu.memory_space<vmem>>, %arg4: memref<1x128xf32, #tpu.memory_space<vmem>>, %arg5: memref<1x1xf32, #tpu.memory_space<smem>>, %arg6: memref<8x128xf32, #tpu.memory_space<vmem>>) attributes {dimension_semantics = [#tpu.dimension_semantics<parallel>], iteration_bounds = array<i64: 1>, scalar_prefetch = 0 : i64, scratch_operands = 0 : i64, tpu.core_type = #tpu.core_type<tc>, window_params = [{transform_indices = @transform_0, window_bounds = array<i64: 8, 16>}, {pipeline_mode = #tpu.pipeline_mode<synchronous>, transform_indices = @transform_1, window_bounds = array<i64: 16, 128>}, {pipeline_mode = #tpu.pipeline_mode<synchronous>, transform_indices = @transform_2, window_bounds = array<i64: 1, 128>}, {pipeline_mode = #tpu.pipeline_mode<synchronous>, transform_indices = @transform_3, window_bounds = array<i64: 1, 128>}, {transform_indices = @transform_4, window_bounds = array<i64: 1, 1>}, {transform_indices = @transform_5, window_bounds = array<i64: 8, 128>}]} {
    %c0 = arith.constant 0 : index
    %c0_0 = arith.constant 0 : index
    %0 = vector.load %arg1[%c0, %c0_0] : memref<8x16xf32, #tpu.memory_space<vmem>>, vector<8x16xf32>
    %c0_1 = arith.constant 0 : index
    %c0_2 = arith.constant 0 : index
    %1 = vector.load %arg2[%c0_1, %c0_2] : memref<16x128xf32, #tpu.memory_space<vmem>>, vector<16x128xf32>
    %cst = arith.constant dense<0.000000e+00> : vector<8x128xf32>
    %2 = tpu.matmul %0, %1, %cst {dimension_numbers = #tpu.dot_dimension_numbers<[1], [0], [0], [1], [0, 0, 1, 1], [], []>} : vector<8x16xf32>, vector<16x128xf32>, vector<8x128xf32> -> vector<8x128xf32>
    %c0_3 = arith.constant 0 : index
    %c0_4 = arith.constant 0 : index
    %3 = vector.load %arg3[%c0_3, %c0_4] : memref<1x128xf32, #tpu.memory_space<vmem>>, vector<1x128xf32>
    %4 = vector.broadcast %3 : vector<1x128xf32> to vector<8x128xf32>
    %5 = arith.addf %2, %4 : vector<8x128xf32>
    %cst_5 = arith.constant 0.000000e+00 : f32
    %6 = vector.broadcast %cst_5 : f32 to vector<8x128xf32>
    %7 = arith.maximumf %5, %6 : vector<8x128xf32>
    %c0_6 = arith.constant 0 : index
    %c0_7 = arith.constant 0 : index
    %8 = vector.load %arg4[%c0_6, %c0_7] : memref<1x128xf32, #tpu.memory_space<vmem>>, vector<1x128xf32>
    %9 = vector.broadcast %8 : vector<1x128xf32> to vector<8x128xf32>
    %10 = arith.mulf %7, %9 : vector<8x128xf32>
    %cst_8 = arith.constant dense<0.000000e+00> : vector<8xf32>
    %11 = vector.multi_reduction <add>, %10, %cst_8 [1] : vector<8x128xf32> to vector<8xf32>
    %12 = vector.shape_cast %11 : vector<8xf32> to vector<8x1xf32>
    %c0_9 = arith.constant 0 : index
    %c0_10 = arith.constant 0 : index
    %13 = memref.load %arg5[%c0_9, %c0_10] : memref<1x1xf32, #tpu.memory_space<smem>>
    %14 = vector.broadcast %13 : f32 to vector<8x1xf32>
    %15 = arith.addf %12, %14 : vector<8x1xf32>
    %16 = vector.shape_cast %15 : vector<8x1xf32> to vector<8x1xf32>
    %17 = vector.broadcast %16 : vector<8x1xf32> to vector<8x128xf32>
    %c0_11 = arith.constant 0 : index
    %c0_12 = arith.constant 0 : index
    %18 = vector.load %arg6[%c0_11, %c0_12] : memref<8x128xf32, #tpu.memory_space<vmem>>, vector<8x128xf32>
    tpu.vector_store %arg6[%c0_11, %c0_12], %17 {strides = array<i32>} : memref<8x128xf32, #tpu.memory_space<vmem>>, vector<8x128xf32>,
    return
  }
  func.func @transform_0(%arg0: i32) -> (i32, i32) {
    %c0_i32 = arith.constant 0 : i32
    %c0_i32_0 = arith.constant 0 : i32
    return %arg0, %c0_i32 : i32, i32
  }
  func.func @transform_1(%arg0: i32) -> (i32, i32) {
    %c0_i32 = arith.constant 0 : i32
    %c0_i32_0 = arith.constant 0 : i32
    %c0_i32_1 = arith.constant 0 : i32
    return %c0_i32, %c0_i32_0 : i32, i32
  }
  func.func @transform_2(%arg0: i32) -> (i32, i32) {
    %c0_i32 = arith.constant 0 : i32
    %c0_i32_0 = arith.constant 0 : i32
    %c0_i32_1 = arith.constant 0 : i32
    return %c0_i32, %c0_i32_0 : i32, i32
  }
  func.func @transform_3(%arg0: i32) -> (i32, i32) {
    %c0_i32 = arith.constant 0 : i32
    %c0_i32_0 = arith.constant 0 : i32
    %c0_i32_1 = arith.constant 0 : i32
    return %c0_i32, %c0_i32_0 : i32, i32
  }
  func.func @transform_4(%arg0: i32) -> (i32, i32) {
    %c0_i32 = arith.constant 0 : i32
    %c0_i32_0 = arith.constant 0 : i32
    %c0_i32_1 = arith.constant 0 : i32
    return %c0_i32, %c0_i32_0 : i32, i32
  }
  func.func @transform_5(%arg0: i32) -> (i32, i32) {
    %c0_i32 = arith.constant 0 : i32
    %c0_i32_0 = arith.constant 0 : i32
    return %arg0, %c0_i32 : i32, i32
  }
}

</mosaic_0001>

<bundles_post_ra>
// kernel: tpu_custom_call.1
= control target key start
LH: loop header
LB: loop body
LE: loop exit
PB: predicated region body
PF: predicated region fallthrough
CT: control target
= control target key end

     0   :  { %11 = vsyncpa [#allocation4], 0  ;;  %s252_s0 = inlined_call_operand.hbm [shape: f32[8,16], index: 0, kind: input, shape index: {}]   ;;  %s253_s1 = inlined_call_operand.hbm [shape: f32[16,128], index: 1, kind: input, shape index: {}]   ;;  %s254_s2 = inlined_call_operand.vmem [shape: f32[1,128], index: 2, kind: input, shape index: {}]   ;;  %s255_s3 = inlined_call_operand.vmem [shape: f32[1,128], index: 3, kind: input, shape index: {}]   ;;  %s256_s4 = inlined_call_operand.<no memory space> [shape: f32[1,1], index: 4, kind: input, shape index: {}]   ;;  %s257_s5 = inlined_call_operand.hbm [shape: f32[8,128], index: 5, kind: output, shape index: {}]  }
   0x1   :  { %12 = vsyncpa [#allocation7], 0 }
   0x2   :  { %13 = vsyncpa [#allocation5], 0  ;;  %s19_s20 = sshll.u32 %s252_s0, 4  ;;  %s199_s21 = smov [#allocation3]   ;;  %s20_s20 = int_to_ptr.hbm [resolvable:$true] %s19_s20 }
   0x3   :  { %s21_s22 = sshll.u32 %s199_s21, 4  ;;  %s29_s25 = sshll.u32 %s253_s1, 4  ;;  %s22_s22 = int_to_ptr.vmem [resolvable:$true] %s21_s22  ;;  %s30_s25 = int_to_ptr.hbm [resolvable:$true] %s29_s25 }
   0x4   :  { %24 = dma.hbm_to_vmem [thread:$0]  %s20_s20, 128, %s22_s22, [#allocation4]  }
   0x5   :  { %s200_s26 = smov [#allocation6]   ;;  %s201_s28 = smov 128  }
   0x6   :  { %s31_s27 = sshll.u32 %s200_s26, 4  ;;  %s202_s29 = smov 8   ;;  %s32_s27 = int_to_ptr.vmem [resolvable:$true] %s31_s27 }
   0x7   :  { %37 = dma.hbm_to_vmem [thread:$0]  %s30_s25, 256, %s32_s27, [#allocation7], %s201_s28, %s201_s28, %s202_s29  }
   0x8   :  { %193 = dma.done.wait [#allocation4], 128  }
   0x9   :  { %194 = vsyncadd [#allocation4], 4294967168 }
   0xa   :  { %195 = dma.done.wait [#allocation7], 256  }
   0xb   :  { %196 = vsyncadd [#allocation7], 4294967040  ;;  %v54_v0 = vld [vmem:[#allocation6 + $0x8] sm:$0xff]  ;;  %v53_v1 = vld [vmem:[#allocation6] sm:$0xff]  ;;  %vm59_vm0 = vcmask 130048   ;;  %v92_v9 = vstv %s256_s4  ;;  %s203_s9 = smov [#allocation8]  }
   0xc   :  { %77 = vmatpush.msra.mxu0 %v54_v0  ;;  %v52_v2 = vld [vmem:[#allocation3] sm:$0xff]  ;;  %s100_s10 = sshll.u32 %s203_s9, 4  ;;  %s102_s13 = sshll.u32 %s257_s5, 4  ;;  %s101_s10 = int_to_ptr.vmem [resolvable:$true] %s100_s10  ;;  %s103_s13 = int_to_ptr.hbm [resolvable:$true] %s102_s13 }
   0xd   :  { %v119_v3 = vld [vmem:[%s254_s2] ss:$0 sm:$0xff] }
   0xe   :  { %78 = vmatpush.msra.mxu0 %v53_v1  ;;  %v120_v6 = vld [vmem:[%s255_s3] ss:$0 sm:$0xff] }
   0xf   :  { %113 = vmatmul.msk.f32.vlgmr.msra.gmra.mxu0 %vm59_vm0, %v52_v2 }
  0x8c   :  { %v80_v4 = vpop.f32.mrf.mxu0 }
  0x8d   :  { %v81_v5 = vadd.f32 %v119_v3, %v80_v4 }
  0x8f   :  { %v83_v7 = vmax.f32 %v81_v5, 0.0 }
  0x91   :  { %v88_v8 = vmul.f32 %v120_v6, %v83_v7 }
  0x93   :  { %89 = vadd.xlane.f32.xlu0 %v88_v8 }
 0x106   :  { %v90_v10 = vpop.xlane.xlu0 %89 }
 0x107   :  { %v93_v11 = vadd.f32 %v92_v9, %v90_v10 }
 0x109   :  { %94 = vst [vmem:[#allocation8] sm:$0xff] %v93_v11 }
 0x10a   :  { %105 = dma.vmem_to_hbm [thread:$0]  %s101_s10, 128, %s103_s13, [#allocation5]  }
 0x10b   :  { %197 = dma.done.wait [#allocation5], 128  }
 0x10c   :  { %198 = vsyncadd [#allocation5], 4294967168 }
 0x10d   :  { %110 = vsyncpa [#allocation4], 1 }
 0x10e   :  { %111 = vsyncpa [#allocation7], 1 }
 0x10f   :  { %112 = vsyncpa [#allocation5], 1 }

</bundles_post_ra>
